<compile_context>
chip_gen: v7x
topology: tpu7x:2x2x1
jax: 0.10.0
libtpu: 0.0.40
codegen_flags: <defaults>
</compile_context>

<pallas_src>
import functools

import numpy as np
import jax
import jax.numpy as jnp
from jax.experimental import pallas as pl
from jax.experimental.pallas import tpu as pltpu


# Deterministic "parameters" mirroring FClipTest.__init__ (np.random.uniform
# with a fixed seed instead of a checkpoint load).
_rng = np.random.RandomState(0)
CLIP_LOW = float(_rng.uniform(-1.0, 1.0))    # ~ 0.0976
CLIP_HIGH = float(_rng.uniform(1.0, 2.0))    # ~ 1.7152

_SUB = 8            # sublane granularity
_LANE = 128         # lane granularity
_TARGET_BLOCK_BYTES = 2 * 1024 * 1024  # ~2 MiB per block: with double-buffered
                                       # in + out that's ~8 MiB resident, safe on
                                       # v5e (16 MiB scoped), v6e and v7x (64 MiB).


def _clip_kernel(x_ref, o_ref, *, low, high):
    # low/high are static Python floats -> lowered as cheap VPU immediates.
    o_ref[...] = jnp.clip(x_ref[...], low, high)


def _choose_cols(n):
    """Pick the widest lane-dense column count that needs no padding."""
    for cols in (4096, 2048, 1024, 512, 256, _LANE):
        if n % (cols * _SUB) == 0:
            return cols, False
    # Ragged size: fall back to a fixed width and pad the tail.
    return 512, True


def clip_pallas(x, low=CLIP_LOW, high=CLIP_HIGH):
    """Elementwise clamp(x, low, high) via a tiled, pipelined Pallas TPU kernel."""
    orig_shape = x.shape
    orig_dtype = x.dtype
    n = int(np.prod(orig_shape))
    itemsize = jnp.dtype(orig_dtype).itemsize

    cols, needs_pad = _choose_cols(n)

    x_flat = jnp.ravel(x)
    if needs_pad:
        padded = -(-n // (cols * _SUB)) * (cols * _SUB)
        x_flat = jnp.pad(x_flat, (0, padded - n))
    else:
        padded = n  # fast path: no extra HBM copies for padding / unpadding
    rows = padded // cols
    x2d = x_flat.reshape(rows, cols)

    # Block rows: target ~2 MiB per block, multiple of 8, capped at the array.
    block_rows = max(_SUB, (_TARGET_BLOCK_BYTES // (cols * itemsize)) // _SUB * _SUB)
    block_rows = min(block_rows, rows)
    grid = (pl.cdiv(rows, block_rows),)

    kernel = functools.partial(_clip_kernel, low=float(low), high=float(high))

    out2d = pl.pallas_call(
        kernel,
        out_shape=jax.ShapeDtypeStruct((rows, cols), orig_dtype),
        grid=grid,
        in_specs=[pl.BlockSpec((block_rows, cols), lambda i: (i, 0))],
        out_specs=pl.BlockSpec((block_rows, cols), lambda i: (i, 0)),
        compiler_params=pltpu.CompilerParams(
            dimension_semantics=("parallel",),  # lets v7x shard the grid over 2 TCs
        ),
    )(x2d)

    if needs_pad:
        return out2d.reshape(-1)[:n].reshape(orig_shape)
    return out2d.reshape(orig_shape)


if __name__ == "__main__":
    key = jax.random.PRNGKey(0)
    # NCHW input, small shapes consistent with the module's forward.
    x = jax.random.normal(key, (2, 4, 16, 16), dtype=jnp.float32) * 2.0

    out = clip_pallas(x)
    out = jax.block_until_ready(out)

    # Reference check against plain JAX clamp semantics (== torch.clamp).
    ref = jnp.clip(x, CLIP_LOW, CLIP_HIGH)
    np.testing.assert_allclose(np.asarray(out), np.asarray(ref), rtol=0, atol=0)

    print("KERNEL_OK")
</pallas_src>

<mosaic_0001>
module attributes {stable_mosaic.version = 11 : i64} {
  func.func @_clip_kernel(%arg0: i32, %arg1: memref<8x256xf32, #tpu.memory_space<vmem>>, %arg2: memref<8x256xf32, #tpu.memory_space<vmem>>) attributes {dimension_semantics = [#tpu.dimension_semantics<parallel>], iteration_bounds = array<i64: 1>, scalar_prefetch = 0 : i64, scratch_operands = 0 : i64, tpu.core_type = #tpu.core_type<tc>, window_params = [{transform_indices = @transform_0, window_bounds = array<i64: 8, 256>}, {transform_indices = @transform_1, window_bounds = array<i64: 8, 256>}]} {
    %c0 = arith.constant 0 : index
    %c0_0 = arith.constant 0 : index
    %0 = vector.load %arg1[%c0, %c0_0] : memref<8x256xf32, #tpu.memory_space<vmem>>, vector<8x256xf32>
    %cst = arith.constant 0.0976270064 : f32
    %cst_1 = arith.constant 1.71518934 : f32
    %1 = vector.broadcast %cst : f32 to vector<8x256xf32>
    %2 = arith.maximumf %1, %0 : vector<8x256xf32>
    %3 = vector.broadcast %cst_1 : f32 to vector<8x256xf32>
    %4 = arith.minimumf %3, %2 : vector<8x256xf32>
    %c0_2 = arith.constant 0 : index
    %c0_3 = arith.constant 0 : index
    %5 = vector.load %arg2[%c0_2, %c0_3] : memref<8x256xf32, #tpu.memory_space<vmem>>, vector<8x256xf32>
    tpu.vector_store %arg2[%c0_2, %c0_3], %4 {strides = array<i32>} : memref<8x256xf32, #tpu.memory_space<vmem>>, vector<8x256xf32>,
    return
  }
  func.func @transform_0(%arg0: i32) -> (i32, i32) {
    %c0_i32 = arith.constant 0 : i32
    %c0_i32_0 = arith.constant 0 : i32
    return %arg0, %c0_i32 : i32, i32
  }
  func.func @transform_1(%arg0: i32) -> (i32, i32) {
    %c0_i32 = arith.constant 0 : i32
    %c0_i32_0 = arith.constant 0 : i32
    return %arg0, %c0_i32 : i32, i32
  }
}

</mosaic_0001>

<bundles_post_ra>
// kernel: tpu_custom_call.1
= control target key start
LH: loop header
LB: loop body
LE: loop exit
PB: predicated region body
PF: predicated region fallthrough
CT: control target
= control target key end

     0   :  { %6 = vsyncpa [#allocation3], 0  ;;  %s130_s0 = inlined_call_operand.hbm [shape: f32[8,256], index: 0, kind: input, shape index: {}]   ;;  %s131_s1 = inlined_call_operand.hbm [shape: f32[8,256], index: 1, kind: output, shape index: {}]  }
   0x1   :  { %7 = vsyncpa [#allocation4], 0  ;;  %s94_s6 = smov [#allocation2]   ;;  %s46_s10 = scalar_lea.hbm %s130_s0, 256 }
   0x2   :  { %s14_s7 = sshll.u32 %s94_s6, 4  ;;  %p47_p0 = scmp.ne.s32.totalorder %s130_s0, %s46_s10  ;;  %s15_s7 = int_to_ptr.vmem [resolvable:$true] %s14_s7 }
   0x3   :  { %p50_p1 = scmp.lt.u32.totalorder %s46_s10, %s130_s0 }
   0x5   :  { %p52_p2 = pnand %p50_p1, %p47_p0 }
   0x7   :  { %55 = shalt.err (!%p52_p2)
}
   0x8   :  { %s56_s15 = scalar_lea.vmem %s15_s7, 256  ;;  %p61_p4 = scmp.lt.s32.totalorder %s15_s7, %s15_s7 }
   0x9   :  { %p57_p3 = scmp.ne.s32.totalorder %s15_s7, %s56_s15  ;;  %p62_p5 = scmp.lt.s32.totalorder %s56_s15, %s56_s15 }
   0xb   :  { %p63_p6 = por %p62_p5, %p61_p4 }
   0xd   :  { %p64_p7 = pnand %p63_p6, %p57_p3 }
   0xf   :  { %67 = shalt.err (!%p64_p7)
}
  0x10   :  { %17 = dma.hbm_to_vmem [thread:$0]  %s130_s0, 256, %s15_s7, [#allocation3]  }
  0x11   :  { %90 = dma.done.wait [#allocation3], 256  }
  0x12   :  { %91 = vsyncadd [#allocation3], 4294967040  ;;  %v21_v0 = vld [vmem:[#allocation2] sm:$0xff]  ;;  %v22_v1 = vld [vmem:[#allocation2 + $0x8] sm:$0xff]  ;;  %s95_s18 = smov [#allocation5]  }
  0x13   :  { %s35_s19 = sshll.u32 %s95_s18, 4  ;;  %v23_v2 = vmax.f32 %v21_v0, 0.09762701  ;;  %v24_v3 = vmax.f32 %v22_v1, 0.09762701  ;;  %s36_s19 = int_to_ptr.vmem [resolvable:$true] %s35_s19 }
  0x14   :  { %s68_s20 = scalar_lea.vmem %s36_s19, 256  ;;  %p73_p9 = scmp.lt.s32.totalorder %s36_s19, %s36_s19 }
  0x15   :  { %v25_v4 = vmin.f32 %v23_v2, 1.7151893  ;;  %v26_v5 = vmin.f32 %v24_v3, 1.7151893  ;;  %p69_p8 = scmp.ne.s32.totalorder %s36_s19, %s68_s20  ;;  %p74_p10 = scmp.lt.s32.totalorder %s68_s20, %s68_s20 }
  0x17   :  { %27 = vst [vmem:[#allocation5] sm:$0xff] %v25_v4  ;;  %28 = vst [vmem:[#allocation5 + $0x8] sm:$0xff] %v26_v5  ;;  %p75_p11 = por %p74_p10, %p73_p9 }
  0x19   :  { %p76_p12 = pnand %p75_p11, %p69_p8 }
  0x1b   :  { %79 = shalt.err (!%p76_p12)
}
  0x1c   :  { %s80_s22 = scalar_lea.hbm %s131_s1, 256 }
  0x1d   :  { %p81_p13 = scmp.ne.s32.totalorder %s131_s1, %s80_s22  ;;  %p84_p0 = scmp.lt.u32.totalorder %s80_s22, %s131_s1 }
  0x1f   :  { %p86_p1 = pnand %p84_p0, %p81_p13 }
  0x21   :  { %89 = shalt.err (!%p86_p1)
}
  0x22   :  { %38 = dma.vmem_to_hbm [thread:$0]  %s36_s19, 256, %s131_s1, [#allocation4]  }
  0x23   :  { %92 = dma.done.wait [#allocation4], 256  }
  0x24   :  { %93 = vsyncadd [#allocation4], 4294967040 }
  0x25   :  { %42 = vsyncpa [#allocation3], 1 }
  0x26   :  { %43 = vsyncpa [#allocation4], 1 }

</bundles_post_ra>
